<compile_context>
chip_gen: v6e
topology: v6e:2x2x1
jax: 0.10.0
libtpu: 0.0.40
codegen_flags: <defaults>
</compile_context>

<pallas_src>
import math
import jax
import jax.numpy as jnp
from jax.experimental import pallas as pl
from jax.experimental.pallas import tpu as pltpu

BN_EPS = 1e-5
LANE = 128
SUBLANE = 8


def _round_up(n, m):
    return ((n + m - 1) // m) * m


def _full_vmem_spec(shape):
    # grid=() -> index_map takes no args; full-array VMEM block.
    return pl.BlockSpec(shape, lambda: tuple(0 for _ in shape))


def _make_fused_mlp_kernel(num_layers, b_real, b_pad):
    inv_b = 1.0 / float(b_real)
    need_row_mask = (b_pad != b_real)

    def kernel(*refs):
        x_ref = refs[0]
        layer_refs = refs[1:1 + 2 * num_layers]       # per layer: (W, bn_packed)
        alpha_ref = refs[1 + 2 * num_layers]          # SMEM: (num_layers,) f32
        o_ref = refs[2 + 2 * num_layers]

        h = x_ref[...]                                # bf16, lane-dense
        for li in range(num_layers):                  # unrolled at trace time
            w_ref = layer_refs[2 * li]                # (Fin_p, Fout_p) bf16
            bn_ref = layer_refs[2 * li + 1]           # (8, Fout_p) f32: rows 0=gamma, 1=beta

            # ---- Linear: bf16 MXU matmul, f32 accumulation.
            # The bias is intentionally not added: it cancels exactly under the
            # training-mode BatchNorm that follows (see header comment).
            y = jnp.dot(h, w_ref[...], preferred_element_type=jnp.float32)

            # Zero padded batch rows so they cannot pollute the BN statistics
            # (only emitted when the batch actually needed sublane padding).
            if need_row_mask:
                rows = jax.lax.broadcasted_iota(jnp.int32, y.shape, 0)
                y = jnp.where(rows < b_real, y, 0.0)

            # ---- BatchNorm1d: training-mode batch stats, biased variance,
            #      folded into a single scale/shift ----
            s1 = jnp.sum(y, axis=0, keepdims=True)
            s2 = jnp.sum(y * y, axis=0, keepdims=True)
            mean = s1 * inv_b
            var = jnp.maximum(s2 * inv_b - mean * mean, 0.0)
            gamma = bn_ref[0:1, :]
            beta = bn_ref[1:2, :]
            scale = gamma * jax.lax.rsqrt(var + BN_EPS)   # rsqrt -> EUP slot
            shift = beta - mean * scale
            y = y * scale + shift

            # ---- PReLU: single shared alpha, scalar read from SMEM ----
            alpha = alpha_ref[li]
            y = jnp.where(y > 0, y, alpha * y)

            # Intermediate activations stay on-chip; feed the next MXU pass in
            # bf16, keep the final output in f32.
            h = y.astype(jnp.bfloat16) if li + 1 < num_layers else y

        o_ref[...] = h.astype(o_ref.dtype)

    return kernel


def init_mlp_params(key, input_size, hidden_layers):
    """PyTorch-default init, pre-padded to lane-dense (multiples of 128) shapes.

    Weights are stored as (Fin, Fout) so the kernel computes x @ W, which is
    identical to PyTorch's x @ W_pt.T.  Padded rows/cols are zero-filled so
    they contribute nothing (padded gamma is 0 so padded output columns stay
    exactly zero).
    """
    sizes = [input_size] + list(hidden_layers)
    layers = []
    alphas = []
    for fin, fout in zip(sizes[:-1], sizes[1:]):
        key, kw, kb = jax.random.split(key, 3)
        bound = 1.0 / math.sqrt(fin)
        w = jax.random.uniform(kw, (fin, fout), jnp.float32, -bound, bound)
        b = jax.random.uniform(kb, (fout,), jnp.float32, -bound, bound)
        fin_p = _round_up(fin, LANE)
        fout_p = _round_up(fout, LANE)
        w_p = jnp.zeros((fin_p, fout_p), jnp.float32).at[:fin, :fout].set(w)
        # Packed BN params: one aligned (8, Fout_p) tile. Row 0 = gamma (ones
        # on real columns, zero on padding), row 1 = beta (zeros).
        bn_p = jnp.zeros((SUBLANE, fout_p), jnp.float32).at[0, :fout].set(1.0)
        layers.append({
            "w": w_p.astype(jnp.bfloat16),   # bf16 weights: MXU-native, half the DMA bytes
            "w_f32": w_p,                    # kept for the f32 reference check
            "b": b,                          # used only by the reference (cancels under BN)
            "bn": bn_p,
            "fin": fin,
            "fout": fout,
        })
        alphas.append(0.25)                  # nn.PReLU default
    return layers, jnp.asarray(alphas, jnp.float32)


def mlp_forward(x, layers, alphas):
    B, F0 = x.shape
    num_layers = len(layers)
    f0_pad = layers[0]["w"].shape[0]
    b_pad = _round_up(max(B, SUBLANE), SUBLANE)
    f_last = layers[-1]["fout"]
    f_last_pad = layers[-1]["w"].shape[1]

    # Lane-dense, sublane-aligned, zero-padded input (bf16 for the MXU).
    x_p = jnp.zeros((b_pad, f0_pad), jnp.bfloat16).at[:B, :F0].set(
        x.astype(jnp.bfloat16))

    in_specs = [_full_vmem_spec((b_pad, f0_pad))]
    args = [x_p]
    for lyr in layers:
        fin_p, fout_p = lyr["w"].shape
        in_specs += [
            _full_vmem_spec((fin_p, fout_p)),          # W
            _full_vmem_spec((SUBLANE, fout_p)),        # packed gamma/beta
        ]
        args += [lyr["w"], lyr["bn"]]
    # Per-layer PReLU alphas as SMEM scalars.
    in_specs.append(pl.BlockSpec(memory_space=pltpu.MemorySpace.SMEM))
    args.append(alphas)

    out = pl.pallas_call(
        _make_fused_mlp_kernel(num_layers, B, b_pad),
        out_shape=jax.ShapeDtypeStruct((b_pad, f_last_pad), jnp.float32),
        grid=(),
        in_specs=in_specs,
        out_specs=_full_vmem_spec((b_pad, f_last_pad)),
    )(*args)
    return out[:B, :f_last]


def _mlp_reference(x, layers, alphas):
    """Pure-JAX f32 reference (PyTorch-faithful math, bias included)."""
    h = x
    for li, lyr in enumerate(layers):
        fin, fout = lyr["fin"], lyr["fout"]
        w = lyr["w_f32"][:fin, :fout]
        b = lyr["b"]
        y = h @ w + b
        mean = jnp.mean(y, axis=0, keepdims=True)
        var = jnp.mean((y - mean) ** 2, axis=0, keepdims=True)
        y = (y - mean) * jax.lax.rsqrt(var + BN_EPS)
        gamma = lyr["bn"][0, :fout]
        beta = lyr["bn"][1, :fout]
        y = y * gamma + beta
        h = jnp.where(y > 0, y, alphas[li] * y)
    return h


if __name__ == "__main__":
    key = jax.random.PRNGKey(0)
    kx, kp = jax.random.split(key)

    batch = 8
    input_size = 32
    hidden_layers = [32, 16]

    x = jax.random.normal(kx, (batch, input_size), jnp.float32)
    layers, alphas = init_mlp_params(kp, input_size, hidden_layers)

    out = mlp_forward(x, layers, alphas)
    jax.block_until_ready(out)
    assert out.shape == (batch, hidden_layers[-1])

    # Sanity check against the f32 reference (loose tol: kernel uses bf16 MXU inputs).
    ref = _mlp_reference(x, layers, alphas)
    assert jnp.allclose(out, ref, atol=5e-2, rtol=5e-2), float(
        jnp.max(jnp.abs(out - ref)))

    print("KERNEL_OK")
</pallas_src>

<mosaic_0001>
module attributes {stable_mosaic.version = 11 : i64} {
  func.func @kernel(%arg0: memref<8x128xbf16, #tpu.memory_space<vmem>>, %arg1: memref<128x128xbf16, #tpu.memory_space<vmem>>, %arg2: memref<8x128xf32, #tpu.memory_space<vmem>>, %arg3: memref<128x128xbf16, #tpu.memory_space<vmem>>, %arg4: memref<8x128xf32, #tpu.memory_space<vmem>>, %arg5: memref<2xf32, #tpu.memory_space<smem>>, %arg6: memref<8x128xf32, #tpu.memory_space<vmem>>) attributes {dimension_semantics = [], scalar_prefetch = 0 : i64, scratch_operands = 0 : i64, tpu.core_type = #tpu.core_type<tc>} {
    %c0 = arith.constant 0 : index
    %c0_0 = arith.constant 0 : index
    %0 = vector.load %arg0[%c0, %c0_0] : memref<8x128xbf16, #tpu.memory_space<vmem>>, vector<8x128xbf16>
    %c0_1 = arith.constant 0 : index
    %c0_2 = arith.constant 0 : index
    %1 = vector.load %arg1[%c0_1, %c0_2] : memref<128x128xbf16, #tpu.memory_space<vmem>>, vector<128x128xbf16>
    %cst = arith.constant dense<0.000000e+00> : vector<8x128xf32>
    %2 = tpu.matmul %0, %1, %cst {dimension_numbers = #tpu.dot_dimension_numbers<[1], [0], [0], [1], [0, 0, 1, 1], [], []>} : vector<8x128xbf16>, vector<128x128xbf16>, vector<8x128xf32> -> vector<8x128xf32>
    %cst_3 = arith.constant dense<0.000000e+00> : vector<128xf32>
    %3 = vector.multi_reduction <add>, %2, %cst_3 [0] : vector<8x128xf32> to vector<128xf32>
    %4 = vector.shape_cast %3 : vector<128xf32> to vector<1x128xf32>
    %5 = arith.mulf %2, %2 : vector<8x128xf32>
    %cst_4 = arith.constant dense<0.000000e+00> : vector<128xf32>
    %6 = vector.multi_reduction <add>, %5, %cst_4 [0] : vector<8x128xf32> to vector<128xf32>
    %7 = vector.shape_cast %6 : vector<128xf32> to vector<1x128xf32>
    %cst_5 = arith.constant 1.250000e-01 : f32
    %8 = vector.broadcast %cst_5 : f32 to vector<1x128xf32>
    %9 = arith.mulf %4, %8 : vector<1x128xf32>
    %cst_6 = arith.constant 1.250000e-01 : f32
    %10 = vector.broadcast %cst_6 : f32 to vector<1x128xf32>
    %11 = arith.mulf %7, %10 : vector<1x128xf32>
    %12 = arith.mulf %9, %9 : vector<1x128xf32>
    %13 = arith.subf %11, %12 : vector<1x128xf32>
    %cst_7 = arith.constant 0.000000e+00 : f32
    %14 = vector.broadcast %cst_7 : f32 to vector<1x128xf32>
    %15 = arith.maximumf %13, %14 : vector<1x128xf32>
    %c0_8 = arith.constant 0 : index
    %c0_9 = arith.constant 0 : index
    %16 = vector.load %arg2[%c0_8, %c0_9] : memref<8x128xf32, #tpu.memory_space<vmem>>, vector<1x128xf32>
    %c1 = arith.constant 1 : index
    %c0_10 = arith.constant 0 : index
    %17 = vector.load %arg2[%c1, %c0_10] : memref<8x128xf32, #tpu.memory_space<vmem>>, vector<1x128xf32>
    %cst_11 = arith.constant 9.99999974E-6 : f32
    %18 = vector.broadcast %cst_11 : f32 to vector<1x128xf32>
    %19 = arith.addf %15, %18 : vector<1x128xf32>
    %20 = math.rsqrt %19 : vector<1x128xf32>
    %21 = arith.mulf %16, %20 : vector<1x128xf32>
    %22 = arith.mulf %9, %21 : vector<1x128xf32>
    %23 = arith.subf %17, %22 : vector<1x128xf32>
    %24 = vector.broadcast %21 : vector<1x128xf32> to vector<8x128xf32>
    %25 = arith.mulf %2, %24 : vector<8x128xf32>
    %26 = vector.broadcast %23 : vector<1x128xf32> to vector<8x128xf32>
    %27 = arith.addf %25, %26 : vector<8x128xf32>
    %c0_12 = arith.constant 0 : index
    %28 = memref.load %arg5[%c0_12] : memref<2xf32, #tpu.memory_space<smem>>
    %cst_13 = arith.constant 0.000000e+00 : f32
    %29 = vector.broadcast %cst_13 : f32 to vector<8x128xf32>
    %30 = arith.cmpf ogt, %27, %29 : vector<8x128xf32>
    %31 = vector.broadcast %28 : f32 to vector<8x128xf32>
    %32 = arith.mulf %31, %27 : vector<8x128xf32>
    %33 = arith.select %30, %27, %32 : vector<8x128xi1>, vector<8x128xf32>
    %34 = arith.truncf %33 : vector<8x128xf32> to vector<8x128xbf16>
    %c0_14 = arith.constant 0 : index
    %c0_15 = arith.constant 0 : index
    %35 = vector.load %arg3[%c0_14, %c0_15] : memref<128x128xbf16, #tpu.memory_space<vmem>>, vector<128x128xbf16>
    %cst_16 = arith.constant dense<0.000000e+00> : vector<8x128xf32>
    %36 = tpu.matmul %34, %35, %cst_16 {dimension_numbers = #tpu.dot_dimension_numbers<[1], [0], [0], [1], [0, 0, 1, 1], [], []>} : vector<8x128xbf16>, vector<128x128xbf16>, vector<8x128xf32> -> vector<8x128xf32>
    %cst_17 = arith.constant dense<0.000000e+00> : vector<128xf32>
    %37 = vector.multi_reduction <add>, %36, %cst_17 [0] : vector<8x128xf32> to vector<128xf32>
    %38 = vector.shape_cast %37 : vector<128xf32> to vector<1x128xf32>
    %39 = arith.mulf %36, %36 : vector<8x128xf32>
    %cst_18 = arith.constant dense<0.000000e+00> : vector<128xf32>
    %40 = vector.multi_reduction <add>, %39, %cst_18 [0] : vector<8x128xf32> to vector<128xf32>
    %41 = vector.shape_cast %40 : vector<128xf32> to vector<1x128xf32>
    %cst_19 = arith.constant 1.250000e-01 : f32
    %42 = vector.broadcast %cst_19 : f32 to vector<1x128xf32>
    %43 = arith.mulf %38, %42 : vector<1x128xf32>
    %cst_20 = arith.constant 1.250000e-01 : f32
    %44 = vector.broadcast %cst_20 : f32 to vector<1x128xf32>
    %45 = arith.mulf %41, %44 : vector<1x128xf32>
    %46 = arith.mulf %43, %43 : vector<1x128xf32>
    %47 = arith.subf %45, %46 : vector<1x128xf32>
    %cst_21 = arith.constant 0.000000e+00 : f32
    %48 = vector.broadcast %cst_21 : f32 to vector<1x128xf32>
    %49 = arith.maximumf %47, %48 : vector<1x128xf32>
    %c0_22 = arith.constant 0 : index
    %c0_23 = arith.constant 0 : index
    %50 = vector.load %arg4[%c0_22, %c0_23] : memref<8x128xf32, #tpu.memory_space<vmem>>, vector<1x128xf32>
    %c1_24 = arith.constant 1 : index
    %c0_25 = arith.constant 0 : index
    %51 = vector.load %arg4[%c1_24, %c0_25] : memref<8x128xf32, #tpu.memory_space<vmem>>, vector<1x128xf32>
    %cst_26 = arith.constant 9.99999974E-6 : f32
    %52 = vector.broadcast %cst_26 : f32 to vector<1x128xf32>
    %53 = arith.addf %49, %52 : vector<1x128xf32>
    %54 = math.rsqrt %53 : vector<1x128xf32>
    %55 = arith.mulf %50, %54 : vector<1x128xf32>
    %56 = arith.mulf %43, %55 : vector<1x128xf32>
    %57 = arith.subf %51, %56 : vector<1x128xf32>
    %58 = vector.broadcast %55 : vector<1x128xf32> to vector<8x128xf32>
    %59 = arith.mulf %36, %58 : vector<8x128xf32>
    %60 = vector.broadcast %57 : vector<1x128xf32> to vector<8x128xf32>
    %61 = arith.addf %59, %60 : vector<8x128xf32>
    %c1_27 = arith.constant 1 : index
    %62 = memref.load %arg5[%c1_27] : memref<2xf32, #tpu.memory_space<smem>>
    %cst_28 = arith.constant 0.000000e+00 : f32
    %63 = vector.broadcast %cst_28 : f32 to vector<8x128xf32>
    %64 = arith.cmpf ogt, %61, %63 : vector<8x128xf32>
    %65 = vector.broadcast %62 : f32 to vector<8x128xf32>
    %66 = arith.mulf %65, %61 : vector<8x128xf32>
    %67 = arith.select %64, %61, %66 : vector<8x128xi1>, vector<8x128xf32>
    %c0_29 = arith.constant 0 : index
    %c0_30 = arith.constant 0 : index
    %68 = vector.load %arg6[%c0_29, %c0_30] : memref<8x128xf32, #tpu.memory_space<vmem>>, vector<8x128xf32>
    tpu.vector_store %arg6[%c0_29, %c0_30], %67 {strides = array<i32>} : memref<8x128xf32, #tpu.memory_space<vmem>>, vector<8x128xf32>,
    return
  }
}

</mosaic_0001>

<bundles_post_ra>
// kernel: tpu_custom_call.1
= control target key start
LH: loop header
LB: loop body
LE: loop exit
PB: predicated region body
PF: predicated region fallthrough
CT: control target
= control target key end

     0   :  { %11 = vsyncpa [#allocation3], 0  ;;  %s724_s0 = inlined_call_operand.hbm [shape: bf16[8,128], index: 0, kind: input, shape index: {}]   ;;  %s725_s1 = inlined_call_operand.hbm [shape: bf16[128,128], index: 1, kind: input, shape index: {}]   ;;  %s726_s2 = inlined_call_operand.hbm [shape: f32[8,128], index: 2, kind: input, shape index: {}]   ;;  %s727_s3 = inlined_call_operand.hbm [shape: bf16[128,128], index: 3, kind: input, shape index: {}]   ;;  %s728_s4 = inlined_call_operand.hbm [shape: f32[8,128], index: 4, kind: input, shape index: {}]   ;;  %s729_s5 = inlined_call_operand.vmem [shape: f32[2], index: 5, kind: input, shape index: {}]   ;;  %s730_s6 = inlined_call_operand.hbm [shape: f32[8,128], index: 6, kind: output, shape index: {}]  }
   0x1   :  { %12 = vsyncpa [#allocation7], 0 }
   0x2   :  { %13 = vsyncpa [#allocation10], 0 }
   0x3   :  { %14 = vsyncpa [#allocation5], 0 }
   0x4   :  { %15 = vsyncpa [#allocation4], 0  ;;  %s657_s21 = smov [#allocation6]  }
   0x5   :  { %s31_s22 = sshll.u32 %s657_s21, 4  ;;  %s32_s22 = int_to_ptr.vmem [resolvable:$true] %s31_s22 }
   0x6   :  { %s523_s23 = scalar_lea.vmem %s32_s22, 1024  ;;  %p528_p1 = scmp.lt.s32.totalorder %s32_s22, %s32_s22 }
   0x7   :  { %p524_p0 = scmp.ne.s32.totalorder %s32_s22, %s523_s23  ;;  %p529_p2 = scmp.lt.s32.totalorder %s523_s23, %s523_s23 }
   0x9   :  { %p530_p3 = por %p529_p2, %p528_p1 }
   0xb   :  { %p531_p4 = pnand %p530_p3, %p524_p0 }
   0xd   :  { %534 = shalt.err (!%p531_p4)
}
   0xe   :  { %s658_s24 = smov 64   ;;  %s659_s25 = smov 4  }
   0xf   :  { %37 = dma.hbm_to_vmem [thread:$0]  %s725_s1, 1024, %s32_s22, [#allocation7], %s658_s24, %s658_s24, %s659_s25  }
  0x10   :  { %s660_s28 = smov [#allocation9]   ;;  %s661_s30 = smov [#allocation2]  }
  0x11   :  { %s53_s29 = sshll.u32 %s660_s28, 4  ;;  %s22_s7 = sshll.u32 %s661_s30, 4  ;;  %s54_s29 = int_to_ptr.vmem [resolvable:$true] %s53_s29  ;;  %s23_s7 = int_to_ptr.vmem [resolvable:$true] %s22_s7 }
  0x12   :  { %s543_s8 = scalar_lea.vmem %s54_s29, 1024  ;;  %p548_p6 = scmp.lt.s32.totalorder %s54_s29, %s54_s29 }
  0x13   :  { %p544_p5 = scmp.ne.s32.totalorder %s54_s29, %s543_s8  ;;  %p549_p7 = scmp.lt.s32.totalorder %s543_s8, %s543_s8 }
  0x15   :  { %p550_p8 = por %p549_p7, %p548_p6 }
  0x17   :  { %p551_p9 = pnand %p550_p8, %p544_p5 }
  0x19   :  { %554 = shalt.err (!%p551_p9)
}
  0x1a   :  { %59 = dma.hbm_to_vmem [thread:$0]  %s727_s3, 1024, %s54_s29, [#allocation10], %s658_s24, %s658_s24, %s659_s25  }
  0x1b   :  { %s563_s11 = scalar_lea.vmem %s23_s7, 64  ;;  %p568_p11 = scmp.lt.s32.totalorder %s23_s7, %s23_s7 }
  0x1c   :  { %p564_p10 = scmp.ne.s32.totalorder %s23_s7, %s563_s11  ;;  %p569_p12 = scmp.lt.s32.totalorder %s563_s11, %s563_s11 }
  0x1e   :  { %p570_p13 = por %p569_p12, %p568_p11 }
  0x20   :  { %p571_p0 = pnand %p570_p13, %p564_p10 }
  0x22   :  { %574 = shalt.err (!%p571_p0)
}
  0x23   :  { %25 = dma.hbm_to_vmem [thread:$0]  %s724_s0, 64, %s23_s7, [#allocation3]  }
  0x24   :  { %s662_s13 = smov [#allocation8]   ;;  %s663_s15 = smov [#allocation11]  }
  0x25   :  { %s44_s14 = sshll.u32 %s662_s13, 4  ;;  %s66_s16 = sshll.u32 %s663_s15, 4  ;;  %s45_s14 = int_to_ptr.vmem [resolvable:$true] %s44_s14  ;;  %s67_s16 = int_to_ptr.vmem [resolvable:$true] %s66_s16 }
  0x26   :  { %s583_s17 = scalar_lea.vmem %s45_s14, 128  ;;  %p588_p2 = scmp.lt.s32.totalorder %s45_s14, %s45_s14 }
  0x27   :  { %p584_p1 = scmp.ne.s32.totalorder %s45_s14, %s583_s17  ;;  %p589_p3 = scmp.lt.s32.totalorder %s583_s17, %s583_s17 }
  0x29   :  { %p590_p4 = por %p589_p3, %p588_p2 }
  0x2b   :  { %p591_p5 = pnand %p590_p4, %p584_p1 }
  0x2d   :  { %594 = shalt.err (!%p591_p5)
}
  0x2e   :  { %47 = dma.hbm_to_vmem [thread:$0]  %s726_s2, 128, %s45_s14, [#allocation7]  }
  0x2f   :  { %s76_s0 = sshll.u32 %s729_s5, 4  ;;  %s603_s21 = scalar_lea.vmem %s67_s16, 128  ;;  %s77_s0 = int_to_ptr.vmem [resolvable:$true] %s76_s0 }
  0x30   :  { %p604_p6 = scmp.ne.s32.totalorder %s67_s16, %s603_s21  ;;  %p608_p7 = scmp.lt.s32.totalorder %s67_s16, %s67_s16 }
  0x31   :  { %p609_p8 = scmp.lt.s32.totalorder %s603_s21, %s603_s21 }
  0x33   :  { %p610_p9 = por %p609_p8, %p608_p7 }
  0x35   :  { %p611_p10 = pnand %p610_p9, %p604_p6 }
  0x37   :  { %614 = shalt.err (!%p611_p10)
}
  0x38   :  { %69 = dma.hbm_to_vmem [thread:$0]  %s728_s4, 128, %s67_s16, [#allocation10]  }
  0x39   :  { %s615_s24 = scalar_lea.vmem %s77_s0, 16  ;;  %p620_p12 = scmp.lt.s32.totalorder %s77_s0, %s77_s0 }
  0x3a   :  { %p616_p11 = scmp.ne.s32.totalorder %s77_s0, %s615_s24  ;;  %p621_p13 = scmp.lt.s32.totalorder %s615_s24, %s615_s24 }
  0x3c   :  { %p622_p0 = por %p621_p13, %p620_p12 }
  0x3e   :  { %p623_p1 = pnand %p622_p0, %p616_p11 }
  0x40   :  { %626 = shalt.err (!%p623_p1)
}
  0x41   :  { %s664_s2 = smov [#allocation12]  }
  0x42   :  { %79 = dma.vmem_to_smem %s77_s0, 16, %s664_s2, [#allocation5]  }
  0x43   :  { %647 = dma.done.wait [#allocation3], 64  }
  0x44   :  { %648 = vsyncadd [#allocation3], 4294967232 }
  0x45   :  { %649 = dma.done.wait [#allocation7], 1152  }
  0x46   :  { %650 = vsyncadd [#allocation7], 4294966144 }
  0x47   :  { %651 = dma.done.wait [#allocation10], 1152  }
  0x48   :  { %652 = vsyncadd [#allocation10], 4294966144 }
  0x49   :  { %653 = dma.done.wait [#allocation5], 16  }
  0x4a   :  { %654 = vsyncadd [#allocation5], 4294967280 }
  0x4b   :  { %98 = sfence }
  0x4c   :  { %v495_v0 = vld [vmem:[#allocation6 + $0x38] sm:$0xff]   ;;  %v665_v1 = vmov 0.0   ;;  %v496_v2 = vld [vmem:[#allocation6 + $0x30] sm:$0xff]   ;;  %vm666_vm0 = vmmov 0   ;;  %v497_v3 = vld [vmem:[#allocation6 + $0x28] sm:$0xff]   ;;  %v230_v41 = vlaneseq  ;;  %s240_s4 = sld [smem:[#allocation12]] }
  0x4d   :  { %444 = vmatprep.subr.bf16.mxu0 %v665_v1  ;;  %464 = vmatprep.subr.bf16.mxu1 %v665_v1  ;;  %v498_v4 = vld [vmem:[#allocation6 + $0x20] sm:$0xff]   ;;  %v499_v5 = vld [vmem:[#allocation6 + $0x18] sm:$0xff]   ;;  %v500_v6 = vld [vmem:[#allocation6 + $0x10] sm:$0xff]   ;;  %s425_s5 = sld [smem:[#allocation12 + $0x1]]  ;;  %s667_s25 = smov [#allocation13]  }
  0x4e   :  { %445 = vmatpush3.bf16.msra.mxu0 %v495_v0  ;;  %460 = vmatprep.mubr.msk.bf16.mxu0 %vm666_vm0, %v665_v1  ;;  %v501_v7 = vld [vmem:[#allocation6 + $0x8] sm:$0xff]   ;;  %v502_v8 = vld [vmem:[#allocation6] sm:$0xff]   ;;  %v100_v9 = vld [vmem:[#allocation2] sm:$0xf]  ;;  %v231_v42 = vshrl.u32 %v230_v41, 7  ;;  %s397_s26 = sshll.u32 %s667_s25, 4  ;;  %s398_s26 = int_to_ptr.vmem [resolvable:$true] %s397_s26 }
  0x4f   :  { %446 = vmatprep.subr.bf16.mxu0 %v665_v1  ;;  %480 = vmatprep.mubr.msk.bf16.mxu1 %vm666_vm0, %v665_v1  ;;  %v503_v10 = vld [vmem:[#allocation9 + $0x38] sm:$0xff]   ;;  %v504_v11 = vld [vmem:[#allocation9 + $0x30] sm:$0xff]   ;;  %v505_v12 = vld [vmem:[#allocation9 + $0x28] sm:$0xff]   ;;  %s627_s27 = scalar_lea.vmem %s398_s26, 128  ;;  %p632_p3 = scmp.lt.s32.totalorder %s398_s26, %s398_s26 }
  0x50   :  { %465 = vmatpush3.bf16.msra.mxu1 %v503_v10  ;;  %v506_v13 = vld [vmem:[#allocation9 + $0x20] sm:$0xff]   ;;  %v507_v14 = vld [vmem:[#allocation9 + $0x18] sm:$0xff]   ;;  %v508_v15 = vld [vmem:[#allocation9 + $0x10] sm:$0xff]   ;;  %v232_v44 = vsub.s32 0, %v231_v42  ;;  %p628_p2 = scmp.ne.s32.totalorder %s398_s26, %s627_s27  ;;  %p633_p4 = scmp.lt.s32.totalorder %s627_s27, %s627_s27 }
  0x51   :  { %466 = vmatprep.subr.bf16.mxu1 %v665_v1  ;;  %v509_v16 = vld [vmem:[#allocation9 + $0x8] sm:$0xff]   ;;  %v510_v17 = vld [vmem:[#allocation9] sm:$0xff]   ;;  %v223_v43 = vld [vmem:[#allocation8] sm:$0x1] }
  0x52   :  { %447 = vmatpush3.bf16.msra.mxu0 %v496_v2  ;;  %v224_v47 = vld [vmem:[#allocation8 + $0x1] sm:$0x1]  ;;  %v242_v53 = vstv %s240_s4  ;;  %p634_p5 = por %p633_p4, %p632_p3 }
  0x53   :  { %448 = vmatprep.subr.bf16.mxu0 %v665_v1 }
  0x54   :  { %467 = vmatpush3.bf16.msra.mxu1 %v504_v11  ;;  %p635_p6 = pnand %p634_p5, %p628_p2 }
  0x55   :  { %468 = vmatprep.subr.bf16.mxu1 %v665_v1 }
  0x56   :  { %449 = vmatpush3.bf16.msra.mxu0 %v497_v3 }
  0x57   :  { %450 = vmatprep.subr.bf16.mxu0 %v665_v1 }
  0x58   :  { %469 = vmatpush3.bf16.msra.mxu1 %v505_v12 }
  0x59   :  { %470 = vmatprep.subr.bf16.mxu1 %v665_v1 }
  0x5a   :  { %451 = vmatpush3.bf16.msra.mxu0 %v498_v4 }
  0x5b   :  { %452 = vmatprep.subr.bf16.mxu0 %v665_v1 }
  0x5c   :  { %471 = vmatpush3.bf16.msra.mxu1 %v506_v13 }
  0x5d   :  { %472 = vmatprep.subr.bf16.mxu1 %v665_v1 }
  0x5e   :  { %453 = vmatpush3.bf16.msra.mxu0 %v499_v5 }
  0x5f   :  { %454 = vmatprep.subr.bf16.mxu0 %v665_v1 }
  0x60   :  { %473 = vmatpush3.bf16.msra.mxu1 %v507_v14 }
  0x61   :  { %474 = vmatprep.subr.bf16.mxu1 %v665_v1 }
  0x62   :  { %455 = vmatpush3.bf16.msra.mxu0 %v500_v6 }
  0x63   :  { %456 = vmatprep.subr.bf16.mxu0 %v665_v1 }
  0x64   :  { %475 = vmatpush3.bf16.msra.mxu1 %v508_v15 }
  0x65   :  { %476 = vmatprep.subr.bf16.mxu1 %v665_v1 }
  0x66   :  { %457 = vmatpush3.bf16.msra.mxu0 %v501_v7 }
  0x67   :  { %458 = vmatprep.subr.bf16.mxu0 %v665_v1 }
  0x68   :  { %477 = vmatpush3.bf16.msra.mxu1 %v509_v16 }
  0x69   :  { %478 = vmatprep.subr.bf16.mxu1 %v665_v1 }
  0x6a   :  { %459 = vmatpush3.bf16.msra.mxu0 %v502_v8 }
  0x6c   :  { %479 = vmatpush3.bf16.msra.mxu1 %v510_v17  ;;  %v368_v17 = vld [vmem:[#allocation11] sm:$0x1] }
  0x6d   :  { %461 = vmatmul.mubr.bf16.vlgmr.msra.gmra.mxu0 %v100_v9 }
 0x12d   :  { %v199_v18 = vpop.f32.mrf.mxu0 }
 0x12e   :  { %v205_v19 = vrot.slane %v199_v18, 4  ;;  %v211_v20 = vmul.f32 %v199_v18, %v199_v18 }
 0x12f   :  { %v462_v21 = vpop.f32.mrf.mxu0 }
 0x130   :  { %v206_v22 = vadd.f32 %v205_v19, %v199_v18  ;;  %v212_v23 = vrot.slane %v211_v20, 4 }
 0x131   :  { %v202_v24 = vpop.f32.mrf.mxu0 }
 0x132   :  { %v207_v25 = vrot.slane %v206_v22, 2  ;;  %v213_v26 = vadd.f32 %v212_v23, %v211_v20  ;;  %v369_v20 = vld [vmem:[#allocation11 + $0x1] sm:$0x1] }
 0x133   :  { %v463_v27 = vpop.f32.mrf.mxu0 }
 0x134   :  { %v208_v28 = vadd.f32 %v207_v25, %v206_v22  ;;  %v214_v29 = vrot.slane %v213_v26, 2 }
 0x136   :  { %v209_v30 = vrot.slane %v208_v28, 1  ;;  %v215_v31 = vadd.f32 %v214_v29, %v213_v26  ;;  %v387_v26 = vstv %s425_s5 }
 0x138   :  { %v210_v32 = vadd.f32 %v209_v30, %v208_v28  ;;  %v216_v33 = vrot.slane %v215_v31, 1 }
 0x13a   :  { %v217_v34 = vadd.f32 %v216_v33, %v215_v31  ;;  %v218_v35 = vmul.f32 0.125, %v210_v32 }
 0x13c   :  { %v219_v36 = vmul.f32 0.125, %v217_v34  ;;  %v220_v37 = vmul.f32 %v218_v35, %v218_v35 }
 0x13e   :  { %v221_v38 = vsub.f32 %v219_v36, %v220_v37 }
 0x140   :  { %v222_v39 = vmax.f32 %v221_v38, 0.0 }
 0x142   :  { %v225_v40 = vadd.f32 1e-05, %v222_v39 }
 0x144   :  { %511 = vrsqrt.f32 %v225_v40 }
 0x151   :  { %v512_v45 = vpop.eup %511 }
 0x152   :  { %v227_v46 = vmul.f32 %v512_v45, %v223_v43 }
 0x154   :  { %v228_v48 = vmul.f32 %v227_v46, %v218_v35  ;;  %v233_v49 = vrot.slane %v227_v46, %v232_v44 }
 0x156   :  { %v229_v50 = vsub.f32 %v224_v47, %v228_v48  ;;  %v234_v51 = vmul.f32 %v233_v49, %v199_v18 }
 0x158   :  { %v238_v52 = vrot.slane %v229_v50, %v232_v44 }
 0x15a   :  { %v239_v54 = vadd.f32 %v238_v52, %v234_v51 }
 0x15c   :  { %vm241_vm1 = vcmp.gt.f32.partialorder %v239_v54, 0.0  ;;  %v243_v55 = vmul.f32 %v242_v53, %v239_v54 }
 0x15e   :  { %v244_v56 = vsel %vm241_vm1, %v239_v54, %v243_v55 }
 0x15f   :  { %v245_v57 = vpack.c.bf16 %v244_v56, %v244_v56 }
 0x161   :  { %481 = vmatmul.mubr.bf16.vlgmr.msra.gmra.mxu1 %v245_v57 }
 0x221   :  { %v344_v58 = vpop.f32.mrf.mxu1 }
 0x222   :  { %v350_v59 = vrot.slane %v344_v58, 4  ;;  %v356_v60 = vmul.f32 %v344_v58, %v344_v58 }
 0x223   :  { %v482_v61 = vpop.f32.mrf.mxu1 }
 0x224   :  { %v351_v62 = vadd.f32 %v350_v59, %v344_v58  ;;  %v357_v63 = vrot.slane %v356_v60, 4 }
 0x225   :  { %v347_v0 = vpop.f32.mrf.mxu1 }
 0x226   :  { %v352_v1 = vrot.slane %v351_v62, 2  ;;  %v358_v2 = vadd.f32 %v357_v63, %v356_v60 }
 0x227   :  { %v483_v3 = vpop.f32.mrf.mxu1 }
 0x228   :  { %v353_v4 = vadd.f32 %v352_v1, %v351_v62  ;;  %v359_v5 = vrot.slane %v358_v2, 2 }
 0x22a   :  { %v354_v6 = vrot.slane %v353_v4, 1  ;;  %v360_v7 = vadd.f32 %v359_v5, %v358_v2 }
 0x22c   :  { %v355_v8 = vadd.f32 %v354_v6, %v353_v4  ;;  %v361_v9 = vrot.slane %v360_v7, 1 }
 0x22e   :  { %v362_v10 = vadd.f32 %v361_v9, %v360_v7  ;;  %v363_v11 = vmul.f32 0.125, %v355_v8 }
 0x230   :  { %v364_v12 = vmul.f32 0.125, %v362_v10  ;;  %v365_v13 = vmul.f32 %v363_v11, %v363_v11 }
 0x232   :  { %v366_v14 = vsub.f32 %v364_v12, %v365_v13 }
 0x234   :  { %v367_v15 = vmax.f32 %v366_v14, 0.0 }
 0x236   :  { %v370_v16 = vadd.f32 1e-05, %v367_v15 }
 0x238   :  { %513 = vrsqrt.f32 %v370_v16 }
 0x245   :  { %v514_v18 = vpop.eup %513 }
 0x246   :  { %v372_v19 = vmul.f32 %v514_v18, %v368_v17 }
 0x248   :  { %v378_v21 = vrot.slane %v372_v19, %v232_v44  ;;  %v373_v22 = vmul.f32 %v372_v19, %v363_v11 }
 0x24a   :  { %v374_v23 = vsub.f32 %v369_v20, %v373_v22  ;;  %v379_v24 = vmul.f32 %v378_v21, %v344_v58 }
 0x24c   :  { %v383_v25 = vrot.slane %v374_v23, %v232_v44 }
 0x24e   :  { %v384_v27 = vadd.f32 %v383_v25, %v379_v24 }
 0x250   :  { %vm386_vm2 = vcmp.gt.f32.partialorder %v384_v27, 0.0  ;;  %v388_v28 = vmul.f32 %v387_v26, %v384_v27 }
 0x252   :  { %v389_v29 = vsel %vm386_vm2, %v384_v27, %v388_v28 }
 0x253   :  { %390 = vst [vmem:[#allocation13] sm:$0xff] %v389_v29 }
 0x254   :  { %638 = shalt.err (!%p635_p6)
}
 0x255   :  { %400 = dma.vmem_to_hbm [thread:$0]  %s398_s26, 128, %s730_s6, [#allocation4]  }
 0x256   :  { %655 = dma.done.wait [#allocation4], 128  }
 0x257   :  { %656 = vsyncadd [#allocation4], 4294967168 }
 0x258   :  { %404 = vsyncpa [#allocation3], 1 }
 0x259   :  { %405 = vsyncpa [#allocation7], 1 }
 0x25a   :  { %406 = vsyncpa [#allocation10], 1 }
 0x25b   :  { %407 = vsyncpa [#allocation4], 1 }
 0x25c   :  { %408 = vsyncpa [#allocation5], 1 }

</bundles_post_ra>
